<compile_context>
chip_gen: v6e
topology: v6e:2x2x1
jax: 0.10.0
libtpu: 0.0.40
codegen_flags: <defaults>
</compile_context>

<pallas_src>
import functools

import jax
import jax.numpy as jnp
from jax.experimental import pallas as pl
from jax.experimental.pallas import tpu as pltpu


def _round_up(x, m):
    return (x + m - 1) // m * m


def agent_kernel(*refs):
    """refs = (ob_ref, w0, b0, w1, b1, ..., w_out, b_out, out_ref)."""
    ob_ref, out_ref = refs[0], refs[-1]
    param_refs = refs[1:-1]
    n_hidden = (len(param_refs) - 2) // 2

    x = ob_ref[...]

    # Hidden layers: x = relu(x @ W + b).  MXU accumulates in f32; the
    # activation is cast back to the streaming dtype (f32 or bf16) before the
    # next matmul.
    for i in range(n_hidden):
        w = param_refs[2 * i][...]
        b = param_refs[2 * i + 1][...]          # (1, fan_out), f32
        h = jnp.dot(x, w, preferred_element_type=jnp.float32) + b
        x = jnp.maximum(h, 0.0).astype(w.dtype)

    # Output layer + tanh (f32).  out_ref is (block_b, out_size), unpadded, so
    # the writeback moves exactly the useful bytes.
    w_out = param_refs[-2][...]
    b_out = param_refs[-1][...]
    y = jnp.dot(x, w_out, preferred_element_type=jnp.float32) + b_out
    out_ref[...] = jnp.tanh(y)


@functools.partial(jax.jit, static_argnames=("block_b", "compute_dtype"))
def agent_forward(ob, params, *, block_b=2048, compute_dtype=jnp.float32):
    """ob: (B, input_size) -> actions (B, output_size), f32.

    block_b:       batch rows per grid step (multiple of 8).  2048 fits well
                   under v5e's 16 MiB scoped-VMEM default; 4096-8192 are good
                   on v6e/v7x for very large batches (keep >=2 grid steps so
                   "parallel" can shard across v7x's two TensorCores).
    compute_dtype: dtype of the streamed activations/weights.  bf16 halves the
                   HBM/VMEM traffic and doubles MXU rate on v6e/v7x; the MXU
                   accumulation and relu/tanh stay in f32.
    """
    if block_b % 8 != 0:
        raise ValueError(f"block_b must be a multiple of 8, got {block_b}")

    hidden, (w_out, b_out) = params
    B, in_size = ob.shape
    out_size = w_out.shape[1]

    # Clamp the tile for small batches; keep it a multiple of 8 sublanes.
    tb = min(block_b, _round_up(B, 8))
    grid = (pl.cdiv(B, tb),)        # ragged tail (if any) is masked by Pallas.

    if ob.dtype != compute_dtype:
        # For the full HBM win on v6e/v7x, supply ob already in bf16.
        ob = ob.astype(compute_dtype)

    flat_params = []
    flops = 0
    for w, b in hidden:
        flat_params += [w.astype(compute_dtype), b.astype(jnp.float32)]
        flops += 2 * int(w.shape[0]) * int(w.shape[1])
    flat_params += [w_out.astype(compute_dtype), b_out.astype(jnp.float32)]
    flops += 2 * int(w_out.shape[0]) * int(w_out.shape[1])
    flops *= int(B)

    param_bytes = sum(int(p.size) * int(p.dtype.itemsize) for p in flat_params)
    bytes_accessed = (int(B) * in_size * int(ob.dtype.itemsize)   # ob stream in
                      + int(B) * out_size * 4                     # actions out
                      + param_bytes)

    # Activations tiled over batch (auto double-buffered by BlockSpec);
    # weights/biases use a constant index_map so they are fetched once and stay
    # resident in VMEM across grid steps.
    ob_spec = pl.BlockSpec((tb, in_size), lambda i: (i, 0))
    weight_specs = [pl.BlockSpec(p.shape, lambda i: (0, 0)) for p in flat_params]
    out_spec = pl.BlockSpec((tb, out_size), lambda i: (i, 0))

    return pl.pallas_call(
        agent_kernel,
        out_shape=jax.ShapeDtypeStruct((B, out_size), jnp.float32),
        grid=grid,
        in_specs=[ob_spec] + weight_specs,
        out_specs=out_spec,
        compiler_params=pltpu.CompilerParams(
            dimension_semantics=("parallel",),   # shards grid steps across TCs
            vmem_limit_bytes=32 * 1024 * 1024),
        cost_estimate=pl.CostEstimate(
            flops=flops,
            transcendentals=int(B) * out_size,
            bytes_accessed=bytes_accessed),
    )(ob, *flat_params)


def init_params(key, input_size, layers, output_size):
    """Deterministic synthetic params matching Agent.__init__ layer shapes.

    Weights stored as (in_features, out_features) = W.T of the torch layer;
    biases stored as (1, out_features).
    """
    n_linear = len(layers) + 1
    ks = jax.random.split(key, 2 * n_linear)

    def linear(kw, kb, fan_in, fan_out):
        bound = 1.0 / float(fan_in) ** 0.5
        w = jax.random.uniform(kw, (fan_in, fan_out), jnp.float32, -bound, bound)
        b = jax.random.uniform(kb, (1, fan_out), jnp.float32, -bound, bound)
        return w, b

    hidden = []
    fan_in = input_size
    idx = 0
    for size in layers:                    # self.net hidden layers
        hidden.append(linear(ks[idx], ks[idx + 1], fan_in, size))
        fan_in = size
        idx += 2
    out = linear(ks[idx], ks[idx + 1], fan_in, output_size)   # self.output
    return hidden, out


def agent_reference(ob, params):
    """Pure-JAX reference for correctness checking."""
    hidden, (w_out, b_out) = params
    x = ob
    for w, b in hidden:
        x = jnp.maximum(x @ w + b, 0.0)
    return jnp.tanh(x @ w_out + b_out)


if __name__ == "__main__":
    key = jax.random.PRNGKey(0)
    k_params, k_ob1, k_ob2 = jax.random.split(key, 3)

    # Small "game" dims: input_size=16, hidden layers=(32, 32), output_size=8.
    input_size, output_size = 16, 8
    layers = (32, 32)
    params = init_params(k_params, input_size, layers, output_size)

    # 1) Single-step grid (tile clamps to the small batch), f32.
    ob = jax.random.normal(k_ob1, (16, input_size), jnp.float32)
    out = agent_forward(ob, params)
    jax.block_until_ready(out)
    ref = agent_reference(ob, params)
    assert out.shape == (16, output_size)
    assert jnp.allclose(out, ref, atol=1e-5, rtol=1e-5)

    # 2) Multi-step grid (4 parallel steps of 64 rows), f32.
    ob2 = jax.random.normal(k_ob2, (256, input_size), jnp.float32)
    out2 = agent_forward(ob2, params, block_b=64)
    jax.block_until_ready(out2)
    ref2 = agent_reference(ob2, params)
    assert out2.shape == (256, output_size)
    assert jnp.allclose(out2, ref2, atol=1e-5, rtol=1e-5)

    # 3) bf16 streaming path (v6e/v7x recommendation), f32 accumulation.
    out3 = agent_forward(ob2, params, block_b=64, compute_dtype=jnp.bfloat16)
    jax.block_until_ready(out3)
    assert jnp.allclose(out3, ref2, atol=5e-2, rtol=5e-2)

    print("KERNEL_OK")
</pallas_src>

<mosaic_0001>
module attributes {stable_mosaic.version = 11 : i64} {
  func.func @agent_kernel(%arg0: i32, %arg1: memref<16x16xf32, #tpu.memory_space<vmem>>, %arg2: memref<16x32xf32, #tpu.memory_space<vmem>>, %arg3: memref<1x32xf32, #tpu.memory_space<vmem>>, %arg4: memref<32x32xf32, #tpu.memory_space<vmem>>, %arg5: memref<1x32xf32, #tpu.memory_space<vmem>>, %arg6: memref<32x8xf32, #tpu.memory_space<vmem>>, %arg7: memref<1x8xf32, #tpu.memory_space<vmem>>, %arg8: memref<16x8xf32, #tpu.memory_space<vmem>>) attributes {dimension_semantics = [#tpu.dimension_semantics<parallel>], iteration_bounds = array<i64: 1>, scalar_prefetch = 0 : i64, scratch_operands = 0 : i64, tpu.core_type = #tpu.core_type<tc>, window_params = [{transform_indices = @transform_0, window_bounds = array<i64: 16, 16>}, {pipeline_mode = #tpu.pipeline_mode<synchronous>, transform_indices = @transform_1, window_bounds = array<i64: 16, 32>}, {pipeline_mode = #tpu.pipeline_mode<synchronous>, transform_indices = @transform_2, window_bounds = array<i64: 1, 32>}, {pipeline_mode = #tpu.pipeline_mode<synchronous>, transform_indices = @transform_3, window_bounds = array<i64: 32, 32>}, {pipeline_mode = #tpu.pipeline_mode<synchronous>, transform_indices = @transform_4, window_bounds = array<i64: 1, 32>}, {pipeline_mode = #tpu.pipeline_mode<synchronous>, transform_indices = @transform_5, window_bounds = array<i64: 32, 8>}, {pipeline_mode = #tpu.pipeline_mode<synchronous>, transform_indices = @transform_6, window_bounds = array<i64: 1, 8>}, {transform_indices = @transform_7, window_bounds = array<i64: 16, 8>}]} {
    %c0 = arith.constant 0 : index
    %c0_0 = arith.constant 0 : index
    %0 = vector.load %arg1[%c0, %c0_0] : memref<16x16xf32, #tpu.memory_space<vmem>>, vector<16x16xf32>
    %c0_1 = arith.constant 0 : index
    %c0_2 = arith.constant 0 : index
    %1 = vector.load %arg2[%c0_1, %c0_2] : memref<16x32xf32, #tpu.memory_space<vmem>>, vector<16x32xf32>
    %c0_3 = arith.constant 0 : index
    %c0_4 = arith.constant 0 : index
    %2 = vector.load %arg3[%c0_3, %c0_4] : memref<1x32xf32, #tpu.memory_space<vmem>>, vector<1x32xf32>
    %cst = arith.constant dense<0.000000e+00> : vector<16x32xf32>
    %3 = tpu.matmul %0, %1, %cst {dimension_numbers = #tpu.dot_dimension_numbers<[1], [0], [0], [1], [0, 0, 1, 1], [], []>} : vector<16x16xf32>, vector<16x32xf32>, vector<16x32xf32> -> vector<16x32xf32>
    %4 = vector.broadcast %2 : vector<1x32xf32> to vector<16x32xf32>
    %5 = arith.addf %3, %4 : vector<16x32xf32>
    %cst_5 = arith.constant 0.000000e+00 : f32
    %6 = vector.broadcast %cst_5 : f32 to vector<16x32xf32>
    %7 = arith.maximumf %5, %6 : vector<16x32xf32>
    %c0_6 = arith.constant 0 : index
    %c0_7 = arith.constant 0 : index
    %8 = vector.load %arg4[%c0_6, %c0_7] : memref<32x32xf32, #tpu.memory_space<vmem>>, vector<32x32xf32>
    %c0_8 = arith.constant 0 : index
    %c0_9 = arith.constant 0 : index
    %9 = vector.load %arg5[%c0_8, %c0_9] : memref<1x32xf32, #tpu.memory_space<vmem>>, vector<1x32xf32>
    %cst_10 = arith.constant dense<0.000000e+00> : vector<16x32xf32>
    %10 = tpu.matmul %7, %8, %cst_10 {dimension_numbers = #tpu.dot_dimension_numbers<[1], [0], [0], [1], [0, 0, 1, 1], [], []>} : vector<16x32xf32>, vector<32x32xf32>, vector<16x32xf32> -> vector<16x32xf32>
    %11 = vector.broadcast %9 : vector<1x32xf32> to vector<16x32xf32>
    %12 = arith.addf %10, %11 : vector<16x32xf32>
    %cst_11 = arith.constant 0.000000e+00 : f32
    %13 = vector.broadcast %cst_11 : f32 to vector<16x32xf32>
    %14 = arith.maximumf %12, %13 : vector<16x32xf32>
    %c0_12 = arith.constant 0 : index
    %c0_13 = arith.constant 0 : index
    %15 = vector.load %arg6[%c0_12, %c0_13] : memref<32x8xf32, #tpu.memory_space<vmem>>, vector<32x8xf32>
    %c0_14 = arith.constant 0 : index
    %c0_15 = arith.constant 0 : index
    %16 = vector.load %arg7[%c0_14, %c0_15] : memref<1x8xf32, #tpu.memory_space<vmem>>, vector<1x8xf32>
    %cst_16 = arith.constant dense<0.000000e+00> : vector<16x8xf32>
    %17 = tpu.matmul %14, %15, %cst_16 {dimension_numbers = #tpu.dot_dimension_numbers<[1], [0], [0], [1], [0, 0, 1, 1], [], []>} : vector<16x32xf32>, vector<32x8xf32>, vector<16x8xf32> -> vector<16x8xf32>
    %18 = vector.broadcast %16 : vector<1x8xf32> to vector<16x8xf32>
    %19 = arith.addf %17, %18 : vector<16x8xf32>
    %20 = math.tanh %19 : vector<16x8xf32>
    %c0_17 = arith.constant 0 : index
    %c0_18 = arith.constant 0 : index
    %21 = vector.load %arg8[%c0_17, %c0_18] : memref<16x8xf32, #tpu.memory_space<vmem>>, vector<16x8xf32>
    tpu.vector_store %arg8[%c0_17, %c0_18], %20 {strides = array<i32>} : memref<16x8xf32, #tpu.memory_space<vmem>>, vector<16x8xf32>,
    return
  }
  func.func @transform_0(%arg0: i32) -> (i32, i32) {
    %c0_i32 = arith.constant 0 : i32
    %c0_i32_0 = arith.constant 0 : i32
    return %arg0, %c0_i32 : i32, i32
  }
  func.func @transform_1(%arg0: i32) -> (i32, i32) {
    %c0_i32 = arith.constant 0 : i32
    %c0_i32_0 = arith.constant 0 : i32
    %c0_i32_1 = arith.constant 0 : i32
    return %c0_i32, %c0_i32_0 : i32, i32
  }
  func.func @transform_2(%arg0: i32) -> (i32, i32) {
    %c0_i32 = arith.constant 0 : i32
    %c0_i32_0 = arith.constant 0 : i32
    %c0_i32_1 = arith.constant 0 : i32
    return %c0_i32, %c0_i32_0 : i32, i32
  }
  func.func @transform_3(%arg0: i32) -> (i32, i32) {
    %c0_i32 = arith.constant 0 : i32
    %c0_i32_0 = arith.constant 0 : i32
    %c0_i32_1 = arith.constant 0 : i32
    return %c0_i32, %c0_i32_0 : i32, i32
  }
  func.func @transform_4(%arg0: i32) -> (i32, i32) {
    %c0_i32 = arith.constant 0 : i32
    %c0_i32_0 = arith.constant 0 : i32
    %c0_i32_1 = arith.constant 0 : i32
    return %c0_i32, %c0_i32_0 : i32, i32
  }
  func.func @transform_5(%arg0: i32) -> (i32, i32) {
    %c0_i32 = arith.constant 0 : i32
    %c0_i32_0 = arith.constant 0 : i32
    %c0_i32_1 = arith.constant 0 : i32
    return %c0_i32, %c0_i32_0 : i32, i32
  }
  func.func @transform_6(%arg0: i32) -> (i32, i32) {
    %c0_i32 = arith.constant 0 : i32
    %c0_i32_0 = arith.constant 0 : i32
    %c0_i32_1 = arith.constant 0 : i32
    return %c0_i32, %c0_i32_0 : i32, i32
  }
  func.func @transform_7(%arg0: i32) -> (i32, i32) {
    %c0_i32 = arith.constant 0 : i32
    %c0_i32_0 = arith.constant 0 : i32
    return %arg0, %c0_i32 : i32, i32
  }
}

</mosaic_0001>

<bundles_post_ra>
// kernel: agent_forward.1
= control target key start
LH: loop header
LB: loop body
LE: loop exit
PB: predicated region body
PF: predicated region fallthrough
CT: control target
= control target key end

     0   :  { %12 = vsyncpa [#allocation3], 0  ;;  %s546_s0 = inlined_call_operand.hbm [shape: f32[16,16], index: 0, kind: input, shape index: {}]   ;;  %s547_s1 = inlined_call_operand.hbm [shape: f32[16,32], index: 1, kind: input, shape index: {}]   ;;  %s548_s2 = inlined_call_operand.vmem [shape: f32[1,32], index: 2, kind: input, shape index: {}]   ;;  %s549_s3 = inlined_call_operand.vmem [shape: f32[32,32], index: 3, kind: input, shape index: {}]   ;;  %s550_s4 = inlined_call_operand.vmem [shape: f32[1,32], index: 4, kind: input, shape index: {}]   ;;  %s551_s5 = inlined_call_operand.vmem [shape: f32[32,8], index: 5, kind: input, shape index: {}]   ;;  %s552_s6 = inlined_call_operand.vmem [shape: f32[1,8], index: 6, kind: input, shape index: {}]   ;;  %s553_s7 = inlined_call_operand.vmem [shape: f32[16,8], index: 7, kind: output, shape index: {}]  }
   0x1   :  { %13 = vsyncpa [#allocation5], 0  ;;  %s453_s24 = smov [#allocation2]  }
   0x2   :  { %s19_s25 = sshll.u32 %s453_s24, 4  ;;  %s20_s25 = int_to_ptr.vmem [resolvable:$true] %s19_s25 }
   0x3   :  { %s417_s26 = scalar_lea.vmem %s20_s25, 256  ;;  %p422_p1 = scmp.lt.s32.totalorder %s20_s25, %s20_s25 }
   0x4   :  { %p418_p0 = scmp.ne.s32.totalorder %s20_s25, %s417_s26  ;;  %p423_p2 = scmp.lt.s32.totalorder %s417_s26, %s417_s26 }
   0x6   :  { %p424_p3 = por %p423_p2, %p422_p1 }
   0x8   :  { %p425_p4 = pnand %p424_p3, %p418_p0 }
   0xa   :  { %428 = shalt.err (!%p425_p4)
}
   0xb   :  { %s454_s27 = smov 128   ;;  %s455_s28 = smov 8  }
   0xc   :  { %25 = dma.hbm_to_vmem [thread:$0]  %s546_s0, 256, %s20_s25, [#allocation3], %s454_s27, %s454_s27, %s455_s28  }
   0xd   :  { %s456_s8 = smov [#allocation4]  }
   0xe   :  { %s31_s9 = sshll.u32 %s456_s8, 4  ;;  %s32_s9 = int_to_ptr.vmem [resolvable:$true] %s31_s9 }
   0xf   :  { %s437_s10 = scalar_lea.vmem %s32_s9, 256  ;;  %p442_p6 = scmp.lt.s32.totalorder %s32_s9, %s32_s9 }
  0x10   :  { %p438_p5 = scmp.ne.s32.totalorder %s32_s9, %s437_s10  ;;  %p443_p7 = scmp.lt.s32.totalorder %s437_s10, %s437_s10 }
  0x12   :  { %p444_p8 = por %p443_p7, %p442_p6 }
  0x14   :  { %p445_p9 = pnand %p444_p8, %p438_p5 }
  0x16   :  { %448 = shalt.err (!%p445_p9)
}
  0x17   :  { %37 = dma.hbm_to_vmem [thread:$0]  %s547_s1, 256, %s32_s9, [#allocation5], %s454_s27, %s454_s27, %s455_s28  }
  0x18   :  { %449 = dma.done.wait [#allocation3], 256  }
  0x19   :  { %450 = vsyncadd [#allocation3], 4294967040 }
  0x1a   :  { %451 = dma.done.wait [#allocation5], 256  }
  0x1b   :  { %452 = vsyncadd [#allocation5], 4294967040  ;;  %vm65_vm0 = vcmask 130048   ;;  %v57_v0 = vld [vmem:[#allocation4 + $0x8] sm:$0xff]  ;;  %v56_v1 = vld [vmem:[#allocation4] sm:$0xff]  ;;  %vm160_vm1 = vcmask 261120  }
  0x1c   :  { %v54_v2 = vld [vmem:[#allocation2] sm:$0xff]  ;;  %372 = vmatprep.subr.mxu0 %v57_v0  ;;  %v55_v3 = vld [vmem:[#allocation2 + $0x8] sm:$0xff]  ;;  %v152_v4 = vld [vmem:[%s549_s3 + $0x18] sm:$0xff]  ;;  %vm338_vm2 = vcmask 64512  }
  0x1d   :  { %376 = vmatprep.mubr.msk.f32.mxu0 %vm65_vm0, %v54_v2  ;;  %373 = vmatpush3.msra.mxu0 %v57_v0  ;;  %v151_v5 = vld [vmem:[%s549_s3 + $0x10] sm:$0xff]  ;;  %v150_v6 = vld [vmem:[%s549_s3 + $0x8] sm:$0xff]  ;;  %v149_v7 = vld [vmem:[%s549_s3] sm:$0xff] }
  0x1e   :  { %374 = vmatprep.subr.mxu0 %v56_v1  ;;  %379 = vmatprep.subr.mxu1 %v152_v4  ;;  %v347_v8 = vld [vmem:[%s548_s2] ss:$0 sm:$0xff]  ;;  %v247_v15 = vld [vmem:[%s551_s5 + $0x18] sm:$0xff]  ;;  %v246_v16 = vld [vmem:[%s551_s5 + $0x10] sm:$0xff] }
  0x1f   :  { %375 = vmatpush3.msra.mxu0 %v56_v1  ;;  %380 = vmatpush3.msra.mxu1 %v152_v4  ;;  %v245_v17 = vld [vmem:[%s551_s5 + $0x8] sm:$0xff]  ;;  %v244_v18 = vld [vmem:[%s551_s5] sm:$0xff] }
  0x20   :  { %377 = vmatmul.mubr.msk.f32.vlgmr.msra.gmra.mxu0 %vm65_vm0, %v55_v3  ;;  %381 = vmatprep.subr.mxu1 %v151_v5  ;;  %v350_v19 = vld [vmem:[%s550_s4] ss:$0 sm:$0xff] }
  0x21   :  { %382 = vmatpush3.msra.mxu1 %v151_v5  ;;  %390 = vmatprep.subr.mxu0 %v247_v15  ;;  %v353_v26 = vld [vmem:[%s552_s6] ss:$0 sm:$0xff] }
  0x22   :  { %383 = vmatprep.subr.mxu1 %v150_v6  ;;  %391 = vmatpush3.msra.mxu0 %v247_v15 }
  0x23   :  { %384 = vmatpush3.msra.mxu1 %v150_v6  ;;  %392 = vmatprep.subr.mxu0 %v246_v16 }
  0x24   :  { %385 = vmatprep.subr.mxu1 %v149_v7  ;;  %393 = vmatpush3.msra.mxu0 %v246_v16 }
  0x25   :  { %386 = vmatpush3.msra.mxu1 %v149_v7  ;;  %394 = vmatprep.subr.mxu0 %v245_v17 }
  0x26   :  { %395 = vmatpush3.msra.mxu0 %v245_v17 }
  0x27   :  { %396 = vmatprep.subr.mxu0 %v244_v18 }
  0x28   :  { %397 = vmatpush3.msra.mxu0 %v244_v18 }
  0xe0   :  { %v378_v9 = vpop.f32.mrf.mxu0 }
  0xe1   :  { %v144_v10 = vadd.f32 %v378_v9, %v347_v8 }
  0xe2   :  { %v138_v11 = vpop.f32.mrf.mxu0 }
  0xe3   :  { %v139_v12 = vadd.f32 %v347_v8, %v138_v11  ;;  %v148_v14 = vmax.f32 %v144_v10, 0.0 }
  0xe5   :  { %v147_v13 = vmax.f32 %v139_v12, 0.0 }
  0xe7   :  { %387 = vmatprep.mubr.msk.f32.mxu1 %vm160_vm1, %v147_v13 }
  0xe8   :  { %388 = vmatmul.mubr.msk.f32.vlgmr.msra.gmra.mxu1 %vm160_vm1, %v148_v14 }
 0x1a8   :  { %v389_v20 = vpop.f32.mrf.mxu1 }
 0x1a9   :  { %v239_v21 = vadd.f32 %v389_v20, %v350_v19 }
 0x1aa   :  { %v233_v22 = vpop.f32.mrf.mxu1 }
 0x1ab   :  { %v234_v23 = vadd.f32 %v350_v19, %v233_v22  ;;  %v243_v25 = vmax.f32 %v239_v21, 0.0 }
 0x1ad   :  { %v242_v24 = vmax.f32 %v234_v23, 0.0 }
 0x1af   :  { %398 = vmatprep.mubr.msk.f32.mxu0 %vm160_vm1, %v242_v24 }
 0x1b0   :  { %399 = vmatmul.mubr.msk.f32.vlgmr.msra.gmra.mxu0 %vm160_vm1, %v243_v25 }
 0x270   :  { %v400_v27 = vpop.f32.mrf.mxu0 }
 0x271   :  { %v333_v28 = vadd.f32 %v400_v27, %v353_v26 }
 0x272   :  { %v327_v29 = vpop.f32.mrf.mxu0 }
 0x273   :  { %405 = vtanh.f32 %v333_v28  ;;  %v328_v30 = vadd.f32 %v353_v26, %v327_v29 }
 0x275   :  { %407 = vtanh.f32 %v328_v30 }
 0x280   :  { %v406_v31 = vpop.eup %405 }
 0x281   :  { %340 = vst.msk [vmem:[%s553_s7 + $0x8] sm:$0xff] %vm338_vm2, %v406_v31 }
 0x282   :  { %v408_v32 = vpop.eup %407 }
 0x283   :  { %339 = vst.msk [vmem:[%s553_s7] sm:$0xff] %vm338_vm2, %v408_v32 }
 0x284   :  { %345 = vsyncpa [#allocation3], 1 }
 0x285   :  { %346 = vsyncpa [#allocation5], 1 }

</bundles_post_ra>
